<compile_context>
chip_gen: v7x
topology: tpu7x:2x2x1
jax: 0.10.0
libtpu: 0.0.40
codegen_flags: <defaults>
</compile_context>

<pallas_src>
import jax
import jax.numpy as jnp
from jax.experimental import pallas as pl
from jax.experimental.pallas import tpu as pltpu


def _round_up(n, m):
    return (n + m - 1) // m * m


def _maybe_pad2d(a, rows, cols, dtype):
    """Zero-pad a 2-D array to (rows, cols) and cast; no-op if already matching."""
    if a.shape == (rows, cols) and a.dtype == jnp.dtype(dtype):
        return a  # avoid a separate pad/cast pass over the dominant HBM stream
    out = jnp.pad(a, ((0, rows - a.shape[0]), (0, cols - a.shape[1])))
    return out.astype(dtype)


def _choose_batch_tiling(B, block_batch):
    """Pick (TB, Bp, num_tiles): balanced 128-aligned tiles, < 128 rows of padding,
    and >= 2 tiles whenever possible so both v7x TensorCores get work."""
    if B <= 128:
        TB = max(8, _round_up(B, 8))  # single tile; block == full array dims
        return TB, TB, 1
    Bp = _round_up(B, 128)
    n128 = Bp // 128
    TB = 128
    for k in range(1, n128 + 1):
        if n128 % k:
            continue
        tb = 128 * k
        if tb <= block_batch and (n128 // k) >= 2:
            TB = max(TB, tb)
    return TB, Bp, Bp // TB


def _vmem_capacity_bytes():
    try:
        return int(pltpu.get_tpu_info().vmem_capacity_bytes)
    except Exception:
        return 64 << 20  # conservative default (v7x per-TensorCore VMEM)


def _mlp_kernel(x_ref, w1_ref, b1_ref, w2_ref, b2_ref, w3_ref, b3_ref, o_ref):
    # fc1 + ReLU: MXU matmul in the input dtype, f32 accumulate; elementwise stays f32
    # (v5e VPU/EUP have no bf16).
    h = jnp.dot(x_ref[...], w1_ref[...], preferred_element_type=jnp.float32)
    h = jnp.maximum(h + b1_ref[...], 0.0)
    # dropout -> identity (eval mode)

    # fc2 + ReLU (feed MXU in the weights' dtype; accumulate f32).
    # TODO(synk): keep the fc2 LHS in f32 (multi-pass MXU) if bf16 error compounding matters.
    h = jnp.dot(h.astype(w2_ref.dtype), w2_ref[...],
                preferred_element_type=jnp.float32)
    h = jnp.maximum(h + b2_ref[...], 0.0)
    # dropout -> identity (eval mode)

    # fc3 (out_features == 1): lane reduce first -> (TB, 1) (mostly VALU adds + one
    # small cross-lane reduce), then only a tiny (TB,1)->(1,TB) transpose so the
    # store is a lane-dense (1, TB) row.  Keeps the big tile off the XLU, which
    # shares vector-extended VLIW slots with MXU pushes.
    col = jnp.sum(h * w3_ref[...], axis=-1, keepdims=True)        # (TB, 1)
    logit = jnp.transpose(col) + b3_ref[0]                        # (1, TB)
    o_ref[...] = jax.nn.sigmoid(logit).astype(o_ref.dtype)


def _build_forward(TB, Dp, Hp, Bp, vmem_limit, cost, single_buffer_weights):
    wkw = {"pipeline_mode": pl.Buffered(1)} if single_buffer_weights else {}
    in_specs = [
        pl.BlockSpec((TB, Dp), lambda i: (i, 0)),                 # x (streamed, double-buffered)
        pl.BlockSpec((Dp, Hp), lambda i: (0, 0), **wkw),          # w1 (resident)
        pl.BlockSpec((1, Hp), lambda i: (0, 0), **wkw),           # b1
        pl.BlockSpec((Hp, Hp), lambda i: (0, 0), **wkw),          # w2 (resident)
        pl.BlockSpec((1, Hp), lambda i: (0, 0), **wkw),           # b2
        pl.BlockSpec((1, Hp), lambda i: (0, 0), **wkw),           # w3 row vector (VPU path)
        pl.BlockSpec(memory_space=pltpu.MemorySpace.SMEM),        # b3 scalar
    ]
    return pl.pallas_call(
        _mlp_kernel,
        out_shape=jax.ShapeDtypeStruct((1, Bp), jnp.float32),
        grid_spec=pltpu.PrefetchScalarGridSpec(
            num_scalar_prefetch=0,
            grid=(Bp // TB,),
            in_specs=in_specs,
            out_specs=pl.BlockSpec((1, TB), lambda i: (0, i)),    # lane-dense output row
        ),
        compiler_params=pltpu.CompilerParams(
            dimension_semantics=("parallel",),
            vmem_limit_bytes=int(vmem_limit),
        ),
        cost_estimate=cost,
    )


# Resolved by a one-time probe on the first call (True / False).
_SINGLE_BUFFER_WEIGHTS_OK = None


def process_reward_model_forward(x, params, *, input_dtype=None, block_batch=512):
    """Eval-mode forward of ProcessRewardModel (dropout == identity).

    x: [B, D] float32.  params: w1 [D,H], b1 [H], w2 [H,H], b2 [H], w3 [H,1], b3 [1].
    input_dtype: matmul-input dtype for x/w1/w2 (jnp.bfloat16 recommended on every
      generation — the MXU is bf16-native, HBM traffic and resident VMEM halve;
      accumulation and all elementwise math stay f32).  None keeps x.dtype (f32).
    block_batch: batch-tile upper bound (suggest ~1024 on v5e/v6e, 256-512 on v7x).
    """
    global _SINGLE_BUFFER_WEIGHTS_OK

    w1, b1 = params["w1"], params["b1"]
    w2, b2 = params["w2"], params["b2"]
    w3, b3 = params["w3"], params["b3"]
    B, D = x.shape
    H = w1.shape[1]

    # Lane/sublane friendly padding and balanced batch tiling.
    Dp = max(128, _round_up(D, 128))
    Hp = max(128, _round_up(H, 128))
    TB, Bp, _num_tiles = _choose_batch_tiling(B, block_batch)

    mm_dtype = jnp.dtype(input_dtype) if input_dtype is not None else x.dtype
    itemsize = jnp.dtype(mm_dtype).itemsize

    # Zero-padded operands (padded rows/lanes carry zeros through the whole net).
    x_p = _maybe_pad2d(x, Bp, Dp, mm_dtype)
    w1_p = _maybe_pad2d(w1, Dp, Hp, mm_dtype)
    w2_p = _maybe_pad2d(w2, Hp, Hp, mm_dtype)
    b1_p = _maybe_pad2d(b1.reshape(1, H), 1, Hp, jnp.float32)
    b2_p = _maybe_pad2d(b2.reshape(1, H), 1, Hp, jnp.float32)
    w3_p = _maybe_pad2d(w3.reshape(1, H), 1, Hp, jnp.float32)    # row vector for VPU path
    b3_p = b3.reshape(1).astype(jnp.float32)                     # scalar in SMEM

    flops = 2 * Bp * (Dp * Hp + Hp * Hp + Hp)
    bytes_accessed = ((x_p.size + w1_p.size + w2_p.size) * itemsize
                      + (b1_p.size + b2_p.size + w3_p.size + b3_p.size) * 4
                      + Bp * 4)
    cost = pl.CostEstimate(flops=flops, transcendentals=Bp,
                           bytes_accessed=bytes_accessed)

    def _vmem_limit(weight_buffers):
        resident = weight_buffers * ((w1_p.size + w2_p.size) * itemsize
                                     + (b1_p.size + b2_p.size + w3_p.size) * 4)
        streamed = 2 * (TB * Dp * itemsize + TB * 4)   # double-buffered x tile + out row
        work = 3 * TB * Hp * 4                         # f32 h / fc3 intermediates + slack
        limit = resident + streamed + work + (4 << 20)
        limit = max(limit, 32 << 20)
        return min(limit, _vmem_capacity_bytes() - (8 << 20))  # per-TensorCore cap

    def _run(single_buffer_weights):
        fwd = _build_forward(
            TB, Dp, Hp, Bp,
            vmem_limit=_vmem_limit(1 if single_buffer_weights else 2),
            cost=cost, single_buffer_weights=single_buffer_weights)
        return fwd(x_p, w1_p, b1_p, w2_p, b2_p, w3_p, b3_p)

    if _SINGLE_BUFFER_WEIGHTS_OK is None:
        if hasattr(pl, "Buffered"):
            try:
                out = jax.block_until_ready(_run(True))
                _SINGLE_BUFFER_WEIGHTS_OK = True
            except Exception:
                # pipeline_mode=Buffered(1) not supported by this jax/libtpu: fall back
                # to default (double-buffered) resident weights so the kernel still runs.
                _SINGLE_BUFFER_WEIGHTS_OK = False
                out = _run(False)
        else:
            _SINGLE_BUFFER_WEIGHTS_OK = False
            out = _run(False)
    else:
        out = _run(_SINGLE_BUFFER_WEIGHTS_OK)

    return out.reshape(-1)[:B].reshape(B, 1)


def init_params(key, input_dim, hidden_dim):
    """Deterministic synthetic init mimicking nn.Linear shapes.
    PyTorch Linear stores weight as [out, in]; we keep [in, out] for the kernel."""
    k1, k2, k3, k4, k5, k6 = jax.random.split(key, 6)
    s1 = 1.0 / jnp.sqrt(input_dim)
    s2 = 1.0 / jnp.sqrt(hidden_dim)
    return {
        "w1": jax.random.uniform(k1, (input_dim, hidden_dim), jnp.float32, -s1, s1),
        "b1": jax.random.uniform(k2, (hidden_dim,), jnp.float32, -s1, s1),
        "w2": jax.random.uniform(k3, (hidden_dim, hidden_dim), jnp.float32, -s2, s2),
        "b2": jax.random.uniform(k4, (hidden_dim,), jnp.float32, -s2, s2),
        "w3": jax.random.uniform(k5, (hidden_dim, 1), jnp.float32, -s2, s2),
        "b3": jax.random.uniform(k6, (1,), jnp.float32, -s2, s2),
    }


def _reference_forward(x, p):
    h = jnp.maximum(x @ p["w1"] + p["b1"], 0.0)
    h = jnp.maximum(h @ p["w2"] + p["b2"], 0.0)
    return jax.nn.sigmoid(h @ p["w3"] + p["b3"])


if __name__ == "__main__":
    key = jax.random.PRNGKey(0)
    kx, kp, kx2, kp2 = jax.random.split(key, 4)

    # Small single-tile case.
    batch, input_dim, hidden_dim = 8, 32, 32
    x = jax.random.normal(kx, (batch, input_dim), jnp.float32)
    params = init_params(kp, input_dim, hidden_dim)
    ref = _reference_forward(x, params)

    # f32 path — tight tolerance against the pure-JAX reference.
    out_f32 = jax.block_until_ready(process_reward_model_forward(x, params))
    assert out_f32.shape == (batch, 1), out_f32.shape
    assert jnp.allclose(out_f32, ref, atol=1e-5, rtol=1e-5), "f32 mismatch vs reference"

    # bf16 MXU-input path (bandwidth / resident-VMEM win); f32 accumulate, looser tol.
    out_bf16 = jax.block_until_ready(
        process_reward_model_forward(x, params, input_dtype=jnp.bfloat16))
    assert out_bf16.shape == (batch, 1), out_bf16.shape
    assert jnp.allclose(out_bf16, ref, atol=2e-2, rtol=2e-2), "bf16 mismatch vs reference"

    # Multi-tile case (exercises balanced 128-aligned batch tiling + padded tail).
    batch2, input_dim2, hidden_dim2 = 300, 128, 256
    x2 = jax.random.normal(kx2, (batch2, input_dim2), jnp.float32)
    params2 = init_params(kp2, input_dim2, hidden_dim2)
    ref2 = _reference_forward(x2, params2)
    out2 = jax.block_until_ready(
        process_reward_model_forward(x2, params2, block_batch=128))
    assert out2.shape == (batch2, 1), out2.shape
    assert jnp.allclose(out2, ref2, atol=1e-4, rtol=1e-4), "multi-tile mismatch vs reference"

    print("KERNEL_OK")
</pallas_src>

<mosaic_0001>
module attributes {stable_mosaic.version = 11 : i64} {
  func.func @_mlp_kernel(%arg0: i32, %arg1: memref<8x128xf32, #tpu.memory_space<vmem>>, %arg2: memref<128x128xf32, #tpu.memory_space<vmem>>, %arg3: memref<1x128xf32, #tpu.memory_space<vmem>>, %arg4: memref<128x128xf32, #tpu.memory_space<vmem>>, %arg5: memref<1x128xf32, #tpu.memory_space<vmem>>, %arg6: memref<1x128xf32, #tpu.memory_space<vmem>>, %arg7: memref<1xf32, #tpu.memory_space<smem>>, %arg8: memref<1x8xf32, #tpu.memory_space<vmem>>) attributes {dimension_semantics = [#tpu.dimension_semantics<parallel>], iteration_bounds = array<i64: 1>, scalar_prefetch = 0 : i64, scratch_operands = 0 : i64, tpu.core_type = #tpu.core_type<tc>, window_params = [{transform_indices = @transform_0, window_bounds = array<i64: 8, 128>}, {pipeline_mode = #tpu.pipeline_mode<synchronous>, transform_indices = @transform_1, window_bounds = array<i64: 128, 128>}, {pipeline_mode = #tpu.pipeline_mode<synchronous>, transform_indices = @transform_2, window_bounds = array<i64: 1, 128>}, {pipeline_mode = #tpu.pipeline_mode<synchronous>, transform_indices = @transform_3, window_bounds = array<i64: 128, 128>}, {pipeline_mode = #tpu.pipeline_mode<synchronous>, transform_indices = @transform_4, window_bounds = array<i64: 1, 128>}, {pipeline_mode = #tpu.pipeline_mode<synchronous>, transform_indices = @transform_5, window_bounds = array<i64: 1, 128>}, {transform_indices = @transform_6, window_bounds = array<i64: 1>}, {transform_indices = @transform_7, window_bounds = array<i64: 1, 8>}]} {
    %c0 = arith.constant 0 : index
    %c0_0 = arith.constant 0 : index
    %0 = vector.load %arg1[%c0, %c0_0] : memref<8x128xf32, #tpu.memory_space<vmem>>, vector<8x128xf32>
    %c0_1 = arith.constant 0 : index
    %c0_2 = arith.constant 0 : index
    %1 = vector.load %arg2[%c0_1, %c0_2] : memref<128x128xf32, #tpu.memory_space<vmem>>, vector<128x128xf32>
    %cst = arith.constant dense<0.000000e+00> : vector<8x128xf32>
    %2 = tpu.matmul %0, %1, %cst {dimension_numbers = #tpu.dot_dimension_numbers<[1], [0], [0], [1], [0, 0, 1, 1], [], []>} : vector<8x128xf32>, vector<128x128xf32>, vector<8x128xf32> -> vector<8x128xf32>
    %c0_3 = arith.constant 0 : index
    %c0_4 = arith.constant 0 : index
    %3 = vector.load %arg3[%c0_3, %c0_4] : memref<1x128xf32, #tpu.memory_space<vmem>>, vector<1x128xf32>
    %4 = vector.broadcast %3 : vector<1x128xf32> to vector<8x128xf32>
    %5 = arith.addf %2, %4 : vector<8x128xf32>
    %cst_5 = arith.constant 0.000000e+00 : f32
    %6 = vector.broadcast %cst_5 : f32 to vector<8x128xf32>
    %7 = arith.maximumf %5, %6 : vector<8x128xf32>
    %c0_6 = arith.constant 0 : index
    %c0_7 = arith.constant 0 : index
    %8 = vector.load %arg4[%c0_6, %c0_7] : memref<128x128xf32, #tpu.memory_space<vmem>>, vector<128x128xf32>
    %cst_8 = arith.constant dense<0.000000e+00> : vector<8x128xf32>
    %9 = tpu.matmul %7, %8, %cst_8 {dimension_numbers = #tpu.dot_dimension_numbers<[1], [0], [0], [1], [0, 0, 1, 1], [], []>} : vector<8x128xf32>, vector<128x128xf32>, vector<8x128xf32> -> vector<8x128xf32>
    %c0_9 = arith.constant 0 : index
    %c0_10 = arith.constant 0 : index
    %10 = vector.load %arg5[%c0_9, %c0_10] : memref<1x128xf32, #tpu.memory_space<vmem>>, vector<1x128xf32>
    %11 = vector.broadcast %10 : vector<1x128xf32> to vector<8x128xf32>
    %12 = arith.addf %9, %11 : vector<8x128xf32>
    %cst_11 = arith.constant 0.000000e+00 : f32
    %13 = vector.broadcast %cst_11 : f32 to vector<8x128xf32>
    %14 = arith.maximumf %12, %13 : vector<8x128xf32>
    %c0_12 = arith.constant 0 : index
    %c0_13 = arith.constant 0 : index
    %15 = vector.load %arg6[%c0_12, %c0_13] : memref<1x128xf32, #tpu.memory_space<vmem>>, vector<1x128xf32>
    %16 = vector.broadcast %15 : vector<1x128xf32> to vector<8x128xf32>
    %17 = arith.mulf %14, %16 : vector<8x128xf32>
    %cst_14 = arith.constant dense<0.000000e+00> : vector<8xf32>
    %18 = vector.multi_reduction <add>, %17, %cst_14 [1] : vector<8x128xf32> to vector<8xf32>
    %19 = vector.shape_cast %18 : vector<8xf32> to vector<8x1xf32>
    %20 = tpu.transpose %19, [1, 0] : vector<8x1xf32> -> vector<1x8xf32>
    %c0_15 = arith.constant 0 : index
    %21 = memref.load %arg7[%c0_15] : memref<1xf32, #tpu.memory_space<smem>>
    %22 = vector.broadcast %21 : f32 to vector<1x8xf32>
    %23 = arith.addf %20, %22 : vector<1x8xf32>
    %24 = arith.negf %23 : vector<1x8xf32>
    %25 = math.exp %24 : vector<1x8xf32>
    %cst_16 = arith.constant 1.000000e+00 : f32
    %26 = vector.broadcast %cst_16 : f32 to vector<1x8xf32>
    %27 = arith.addf %26, %25 : vector<1x8xf32>
    %28 = arith.divf %26, %27 : vector<1x8xf32>
    %c0_17 = arith.constant 0 : index
    %c0_18 = arith.constant 0 : index
    %29 = vector.load %arg8[%c0_17, %c0_18] : memref<1x8xf32, #tpu.memory_space<vmem>>, vector<1x8xf32>
    tpu.vector_store %arg8[%c0_17, %c0_18], %28 {strides = array<i32>} : memref<1x8xf32, #tpu.memory_space<vmem>>, vector<1x8xf32>,
    return
  }
  func.func @transform_0(%arg0: i32) -> (i32, i32) {
    %c0_i32 = arith.constant 0 : i32
    %c0_i32_0 = arith.constant 0 : i32
    return %arg0, %c0_i32 : i32, i32
  }
  func.func @transform_1(%arg0: i32) -> (i32, i32) {
    %c0_i32 = arith.constant 0 : i32
    %c0_i32_0 = arith.constant 0 : i32
    %c0_i32_1 = arith.constant 0 : i32
    return %c0_i32, %c0_i32_0 : i32, i32
  }
  func.func @transform_2(%arg0: i32) -> (i32, i32) {
    %c0_i32 = arith.constant 0 : i32
    %c0_i32_0 = arith.constant 0 : i32
    %c0_i32_1 = arith.constant 0 : i32
    return %c0_i32, %c0_i32_0 : i32, i32
  }
  func.func @transform_3(%arg0: i32) -> (i32, i32) {
    %c0_i32 = arith.constant 0 : i32
    %c0_i32_0 = arith.constant 0 : i32
    %c0_i32_1 = arith.constant 0 : i32
    return %c0_i32, %c0_i32_0 : i32, i32
  }
  func.func @transform_4(%arg0: i32) -> (i32, i32) {
    %c0_i32 = arith.constant 0 : i32
    %c0_i32_0 = arith.constant 0 : i32
    %c0_i32_1 = arith.constant 0 : i32
    return %c0_i32, %c0_i32_0 : i32, i32
  }
  func.func @transform_5(%arg0: i32) -> (i32, i32) {
    %c0_i32 = arith.constant 0 : i32
    %c0_i32_0 = arith.constant 0 : i32
    %c0_i32_1 = arith.constant 0 : i32
    return %c0_i32, %c0_i32_0 : i32, i32
  }
  func.func @transform_6(%arg0: i32) -> i32 {
    %c0_i32 = arith.constant 0 : i32
    %c0_i32_0 = arith.constant 0 : i32
    return %c0_i32 : i32
  }
  func.func @transform_7(%arg0: i32) -> (i32, i32) {
    %c0_i32 = arith.constant 0 : i32
    %c0_i32_0 = arith.constant 0 : i32
    return %c0_i32, %arg0 : i32, i32
  }
}

module attributes {stable_mosaic.version = 11 : i64} {
  func.func @_mlp_kernel(%arg0: i32, %arg1: memref<8x128xf32, #tpu.memory_space<vmem>>, %arg2: memref<128x128xf32, #tpu.memory_space<vmem>>, %arg3: memref<1x128xf32, #tpu.memory_space<vmem>>, %arg4: memref<128x128xf32, #tpu.memory_space<vmem>>, %arg5: memref<1x128xf32, #tpu.memory_space<vmem>>, %arg6: memref<1x128xf32, #tpu.memory_space<vmem>>, %arg7: memref<1xf32, #tpu.memory_space<smem>>, %arg8: memref<1x8xf32, #tpu.memory_space<vmem>>) attributes {dimension_semantics = [#tpu.dimension_semantics<parallel>], iteration_bounds = array<i64: 1>, scalar_prefetch = 0 : i64, scratch_operands = 0 : i64, tpu.core_type = #tpu.core_type<tc>, window_params = [{transform_indices = @transform_0, window_bounds = array<i64: 8, 128>}, {pipeline_mode = #tpu.pipeline_mode<synchronous>, transform_indices = @transform_1, window_bounds = array<i64: 128, 128>}, {pipeline_mode = #tpu.pipeline_mode<synchronous>, transform_indices = @transform_2, window_bounds = array<i64: 1, 128>}, {pipeline_mode = #tpu.pipeline_mode<synchronous>, transform_indices = @transform_3, window_bounds = array<i64: 128, 128>}, {pipeline_mode = #tpu.pipeline_mode<synchronous>, transform_indices = @transform_4, window_bounds = array<i64: 1, 128>}, {pipeline_mode = #tpu.pipeline_mode<synchronous>, transform_indices = @transform_5, window_bounds = array<i64: 1, 128>}, {transform_indices = @transform_6, window_bounds = array<i64: 1>}, {transform_indices = @transform_7, window_bounds = array<i64: 1, 8>}]} {
    %c0 = arith.constant 0 : index
    %c0_0 = arith.constant 0 : index
    %0 = vector.load %arg1[%c0, %c0_0] : memref<8x128xf32, #tpu.memory_space<vmem>>, vector<8x128xf32>
    %c0_1 = arith.constant 0 : index
    %c0_2 = arith.constant 0 : index
    %1 = vector.load %arg2[%c0_1, %c0_2] : memref<128x128xf32, #tpu.memory_space<vmem>>, vector<128x128xf32>
    %cst = arith.constant dense<0.000000e+00> : vector<8x128xf32>
    %2 = tpu.matmul %0, %1, %cst {dimension_numbers = #tpu.dot_dimension_numbers<[1], [0], [0], [1], [0, 0, 1, 1], [], []>} : vector<8x128xf32>, vector<128x128xf32>, vector<8x128xf32> -> vector<8x128xf32>
    %c0_3 = arith.constant 0 : index
    %c0_4 = arith.constant 0 : index
    %3 = vector.load %arg3[%c0_3, %c0_4] : memref<1x128xf32, #tpu.memory_space<vmem>>, vector<1x128xf32>
    %4 = vector.broadcast %3 : vector<1x128xf32> to vector<8x128xf32>
    %5 = arith.addf %2, %4 : vector<8x128xf32>
    %cst_5 = arith.constant 0.000000e+00 : f32
    %6 = vector.broadcast %cst_5 : f32 to vector<8x128xf32>
    %7 = arith.maximumf %5, %6 : vector<8x128xf32>
    %c0_6 = arith.constant 0 : index
    %c0_7 = arith.constant 0 : index
    %8 = vector.load %arg4[%c0_6, %c0_7] : memref<128x128xf32, #tpu.memory_space<vmem>>, vector<128x128xf32>
    %cst_8 = arith.constant dense<0.000000e+00> : vector<8x128xf32>
    %9 = tpu.matmul %7, %8, %cst_8 {dimension_numbers = #tpu.dot_dimension_numbers<[1], [0], [0], [1], [0, 0, 1, 1], [], []>} : vector<8x128xf32>, vector<128x128xf32>, vector<8x128xf32> -> vector<8x128xf32>
    %c0_9 = arith.constant 0 : index
    %c0_10 = arith.constant 0 : index
    %10 = vector.load %arg5[%c0_9, %c0_10] : memref<1x128xf32, #tpu.memory_space<vmem>>, vector<1x128xf32>
    %11 = vector.broadcast %10 : vector<1x128xf32> to vector<8x128xf32>
    %12 = arith.addf %9, %11 : vector<8x128xf32>
    %cst_11 = arith.constant 0.000000e+00 : f32
    %13 = vector.broadcast %cst_11 : f32 to vector<8x128xf32>
    %14 = arith.maximumf %12, %13 : vector<8x128xf32>
    %c0_12 = arith.constant 0 : index
    %c0_13 = arith.constant 0 : index
    %15 = vector.load %arg6[%c0_12, %c0_13] : memref<1x128xf32, #tpu.memory_space<vmem>>, vector<1x128xf32>
    %16 = vector.broadcast %15 : vector<1x128xf32> to vector<8x128xf32>
    %17 = arith.mulf %14, %16 : vector<8x128xf32>
    %cst_14 = arith.constant dense<0.000000e+00> : vector<8xf32>
    %18 = vector.multi_reduction <add>, %17, %cst_14 [1] : vector<8x128xf32> to vector<8xf32>
    %19 = vector.shape_cast %18 : vector<8xf32> to vector<8x1xf32>
    %20 = tpu.transpose %19, [1, 0] : vector<8x1xf32> -> vector<1x8xf32>
    %c0_15 = arith.constant 0 : index
    %21 = memref.load %arg7[%c0_15] : memref<1xf32, #tpu.memory_space<smem>>
    %22 = vector.broadcast %21 : f32 to vector<1x8xf32>
    %23 = arith.addf %20, %22 : vector<1x8xf32>
    %24 = arith.negf %23 : vector<1x8xf32>
    %25 = math.exp %24 : vector<1x8xf32>
    %cst_16 = arith.constant 1.000000e+00 : f32
    %26 = vector.broadcast %cst_16 : f32 to vector<1x8xf32>
    %27 = arith.addf %26, %25 : vector<1x8xf32>
    %28 = arith.divf %26, %27 : vector<1x8xf32>
    %c0_17 = arith.constant 0 : index
    %c0_18 = arith.constant 0 : index
    %29 = vector.load %arg8[%c0_17, %c0_18] : memref<1x8xf32, #tpu.memory_space<vmem>>, vector<1x8xf32>
    tpu.vector_store %arg8[%c0_17, %c0_18], %28 {strides = array<i32>} : memref<1x8xf32, #tpu.memory_space<vmem>>, vector<1x8xf32>,
    return
  }
  func.func @transform_0(%arg0: i32) -> (i32, i32) {
    %c0_i32 = arith.constant 0 : i32
    %c0_i32_0 = arith.constant 0 : i32
    return %arg0, %c0_i32 : i32, i32
  }
  func.func @transform_1(%arg0: i32) -> (i32, i32) {
    %c0_i32 = arith.constant 0 : i32
    %c0_i32_0 = arith.constant 0 : i32
    %c0_i32_1 = arith.constant 0 : i32
    return %c0_i32, %c0_i32_0 : i32, i32
  }
  func.func @transform_2(%arg0: i32) -> (i32, i32) {
    %c0_i32 = arith.constant 0 : i32
    %c0_i32_0 = arith.constant 0 : i32
    %c0_i32_1 = arith.constant 0 : i32
    return %c0_i32, %c0_i32_0 : i32, i32
  }
  func.func @transform_3(%arg0: i32) -> (i32, i32) {
    %c0_i32 = arith.constant 0 : i32
    %c0_i32_0 = arith.constant 0 : i32
    %c0_i32_1 = arith.constant 0 : i32
    return %c0_i32, %c0_i32_0 : i32, i32
  }
  func.func @transform_4(%arg0: i32) -> (i32, i32) {
    %c0_i32 = arith.constant 0 : i32
    %c0_i32_0 = arith.constant 0 : i32
    %c0_i32_1 = arith.constant 0 : i32
    return %c0_i32, %c0_i32_0 : i32, i32
  }
  func.func @transform_5(%arg0: i32) -> (i32, i32) {
    %c0_i32 = arith.constant 0 : i32
    %c0_i32_0 = arith.constant 0 : i32
    %c0_i32_1 = arith.constant 0 : i32
    return %c0_i32, %c0_i32_0 : i32, i32
  }
  func.func @transform_6(%arg0: i32) -> i32 {
    %c0_i32 = arith.constant 0 : i32
    %c0_i32_0 = arith.constant 0 : i32
    return %c0_i32 : i32
  }
  func.func @transform_7(%arg0: i32) -> (i32, i32) {
    %c0_i32 = arith.constant 0 : i32
    %c0_i32_0 = arith.constant 0 : i32
    return %c0_i32, %arg0 : i32, i32
  }
}

</mosaic_0001>

<bundles_post_ra>
// kernel: tpu_custom_call.1
= control target key start
LH: loop header
LB: loop body
LE: loop exit
PB: predicated region body
PF: predicated region fallthrough
CT: control target
= control target key end

     0   :  { %13 = vsyncpa [#allocation4], 0  ;;  %s719_s0 = inlined_call_operand.hbm [shape: f32[8,128], index: 0, kind: input, shape index: {}]   ;;  %s720_s1 = inlined_call_operand.hbm [shape: f32[128,128], index: 1, kind: input, shape index: {}]   ;;  %s721_s2 = inlined_call_operand.vmem [shape: f32[1,128], index: 2, kind: input, shape index: {}]   ;;  %s722_s3 = inlined_call_operand.hbm [shape: f32[128,128], index: 3, kind: input, shape index: {}]   ;;  %s723_s4 = inlined_call_operand.vmem [shape: f32[1,128], index: 4, kind: input, shape index: {}]   ;;  %s724_s5 = inlined_call_operand.vmem [shape: f32[1,128], index: 5, kind: input, shape index: {}]   ;;  %s725_s6 = inlined_call_operand.<no memory space> [shape: f32[1], index: 6, kind: input, shape index: {}]   ;;  %s726_s7 = inlined_call_operand.hbm [shape: f32[1,8], index: 7, kind: output, shape index: {}]  }
   0x1   :  { %14 = vsyncpa [#allocation7], 0 }
   0x2   :  { %15 = vsyncpa [#allocation5], 0  ;;  %s588_s24 = smov [#allocation6]   ;;  %s494_s28 = scalar_lea.hbm %s720_s1, 2048 }
   0x3   :  { %s31_s25 = sshll.u32 %s588_s24, 4  ;;  %p495_p0 = scmp.ne.s32.totalorder %s720_s1, %s494_s28  ;;  %s32_s25 = int_to_ptr.vmem [resolvable:$true] %s31_s25 }
   0x4   :  { %p498_p1 = scmp.lt.u32.totalorder %s494_s28, %s720_s1 }
   0x6   :  { %p500_p2 = pnand %p498_p1, %p495_p0 }
   0x8   :  { %503 = shalt.err (!%p500_p2)
}
   0x9   :  { %s504_s10 = scalar_lea.vmem %s32_s25, 2048  ;;  %p509_p4 = scmp.lt.s32.totalorder %s32_s25, %s32_s25 }
   0xa   :  { %p505_p3 = scmp.ne.s32.totalorder %s32_s25, %s504_s10  ;;  %p510_p5 = scmp.lt.s32.totalorder %s504_s10, %s504_s10 }
   0xc   :  { %p511_p6 = por %p510_p5, %p509_p4 }
   0xe   :  { %p512_p7 = pnand %p511_p6, %p505_p3 }
  0x10   :  { %515 = shalt.err (!%p512_p7)
}
  0x11   :  { %s589_s11 = smov 128   ;;  %s590_s12 = smov 8  }
  0x12   :  { %37 = dma.hbm_to_vmem [thread:$0]  %s720_s1, 2048, %s32_s25, [#allocation7], %s589_s11, %s589_s11, %s590_s12  }
  0x13   :  { %s591_s15 = smov [#allocation3]   ;;  %s592_s17 = smov [#allocation8]  }
  0x14   :  { %s22_s16 = sshll.u32 %s591_s15, 4  ;;  %s45_s18 = sshll.u32 %s592_s17, 4  ;;  %s23_s16 = int_to_ptr.vmem [resolvable:$true] %s22_s16  ;;  %s46_s18 = int_to_ptr.vmem [resolvable:$true] %s45_s18 }
  0x15   :  { %s516_s21 = scalar_lea.hbm %s719_s0, 128 }
  0x16   :  { %p517_p8 = scmp.ne.s32.totalorder %s719_s0, %s516_s21  ;;  %p520_p9 = scmp.lt.u32.totalorder %s516_s21, %s719_s0 }
  0x18   :  { %p522_p10 = pnand %p520_p9, %p517_p8 }
  0x1a   :  { %525 = shalt.err (!%p522_p10)
}
  0x1b   :  { %s526_s1 = scalar_lea.vmem %s23_s16, 128  ;;  %p531_p12 = scmp.lt.s32.totalorder %s23_s16, %s23_s16 }
  0x1c   :  { %p527_p11 = scmp.ne.s32.totalorder %s23_s16, %s526_s1  ;;  %p532_p13 = scmp.lt.s32.totalorder %s526_s1, %s526_s1 }
  0x1e   :  { %p533_p0 = por %p532_p13, %p531_p12 }
  0x20   :  { %p534_p1 = pnand %p533_p0, %p527_p11 }
  0x22   :  { %537 = shalt.err (!%p534_p1)
}
  0x23   :  { %25 = dma.hbm_to_vmem [thread:$0]  %s719_s0, 128, %s23_s16, [#allocation4]  }
  0x24   :  { %s538_s30 = scalar_lea.hbm %s722_s3, 2048 }
  0x25   :  { %p539_p2 = scmp.ne.s32.totalorder %s722_s3, %s538_s30  ;;  %p542_p3 = scmp.lt.u32.totalorder %s538_s30, %s722_s3 }
  0x27   :  { %p544_p4 = pnand %p542_p3, %p539_p2 }
  0x29   :  { %547 = shalt.err (!%p544_p4)
}
  0x2a   :  { %s548_s14 = scalar_lea.vmem %s46_s18, 2048  ;;  %p553_p6 = scmp.lt.s32.totalorder %s46_s18, %s46_s18 }
  0x2b   :  { %p549_p5 = scmp.ne.s32.totalorder %s46_s18, %s548_s14  ;;  %p554_p7 = scmp.lt.s32.totalorder %s548_s14, %s548_s14 }
  0x2d   :  { %p555_p8 = por %p554_p7, %p553_p6 }
  0x2f   :  { %p556_p9 = pnand %p555_p8, %p549_p5 }
  0x31   :  { %559 = shalt.err (!%p556_p9)
}
  0x32   :  { %51 = dma.hbm_to_vmem [thread:$0]  %s722_s3, 2048, %s46_s18, [#allocation7], %s589_s11, %s589_s11, %s590_s12  }
  0x33   :  { %582 = dma.done.wait [#allocation4], 128  }
  0x34   :  { %583 = vsyncadd [#allocation4], 4294967168 }
  0x35   :  { %584 = dma.done.wait [#allocation7], 4096  }
  0x36   :  { %585 = vsyncadd [#allocation7], 4294963200  ;;  %v593_v0 = vmov 0.0|0.0   ;;  %vm594_vm0 = vmmov 0   ;;  %v595_v1 = vmov 0.0   ;;  %v68_v2 = vld [vmem:[#allocation6] sm:$0xff] }
  0x37   :  { %433 = vmatprep.subr.bf16.mxu0 %v593_v0  ;;  %395 = vmatprep.mubr.msk.f32.mxu0 %vm594_vm0, %v595_v1  ;;  %v69_v3 = vld [vmem:[#allocation6 + $0x8] sm:$0xff]  ;;  %v70_v4 = vld [vmem:[#allocation6 + $0x10] sm:$0xff]  ;;  %v71_v6 = vld [vmem:[#allocation6 + $0x18] sm:$0xff]  ;;  %vm307_vm1 = vcmask 57344  }
  0x38   :  { %457 = vmatprep.subr.bf16.mxu1 %v593_v0  ;;  %430 = vmatprep.mubr.msk.f32.mxu1 %vm594_vm0, %v595_v1  ;;  %v434_v5 = vpack.c.bf16 %v69_v3, %v68_v2  ;;  %v437_v7 = vpack.c.bf16 %v71_v6, %v70_v4  ;;  %v72_v8 = vld [vmem:[#allocation6 + $0x20] sm:$0xff]  ;;  %v73_v9 = vld [vmem:[#allocation6 + $0x28] sm:$0xff]  ;;  %v164_v12 = vld [vmem:[#allocation8 + $0x10] sm:$0xff] }
  0x39   :  { %v162_v10 = vld [vmem:[#allocation8] sm:$0xff]  ;;  %v163_v11 = vld [vmem:[#allocation8 + $0x8] sm:$0xff]  ;;  %v165_v13 = vld [vmem:[#allocation8 + $0x18] sm:$0xff]  ;;  %v440_v14 = vpack.c.bf16 %v73_v9, %v72_v8 }
  0x3a   :  { %435 = vmatpush3.bf16.msra.mxu0 %v434_v5  ;;  %v458_v15 = vpack.c.bf16 %v163_v11, %v162_v10  ;;  %v74_v16 = vld [vmem:[#allocation6 + $0x30] sm:$0xff]  ;;  %v75_v17 = vld [vmem:[#allocation6 + $0x38] sm:$0xff]  ;;  %v461_v18 = vpack.c.bf16 %v165_v13, %v164_v12  ;;  %v166_v19 = vld [vmem:[#allocation8 + $0x20] sm:$0xff] }
  0x3b   :  { %436 = vmatprep.subr.bf16.mxu0 %v593_v0  ;;  %v167_v20 = vld [vmem:[#allocation8 + $0x28] sm:$0xff]  ;;  %v443_v21 = vpack.c.bf16 %v75_v17, %v74_v16  ;;  %v76_v22 = vld [vmem:[#allocation6 + $0x40] sm:$0xff]  ;;  %v168_v25 = vld [vmem:[#allocation8 + $0x30] sm:$0xff] }
  0x3c   :  { %459 = vmatpush3.bf16.msra.mxu1 %v458_v15  ;;  %v77_v23 = vld [vmem:[#allocation6 + $0x48] sm:$0xff]  ;;  %v464_v24 = vpack.c.bf16 %v167_v20, %v166_v19  ;;  %v169_v26 = vld [vmem:[#allocation8 + $0x38] sm:$0xff]  ;;  %v78_v28 = vld [vmem:[#allocation6 + $0x50] sm:$0xff] }
  0x3d   :  { %460 = vmatprep.subr.bf16.mxu1 %v593_v0  ;;  %v446_v27 = vpack.c.bf16 %v77_v23, %v76_v22  ;;  %v79_v29 = vld [vmem:[#allocation6 + $0x58] sm:$0xff]  ;;  %v467_v30 = vpack.c.bf16 %v169_v26, %v168_v25  ;;  %v170_v31 = vld [vmem:[#allocation8 + $0x40] sm:$0xff]  ;;  %v171_v32 = vld [vmem:[#allocation8 + $0x48] sm:$0xff] }
  0x3e   :  { %438 = vmatpush3.bf16.msra.mxu0 %v437_v7  ;;  %v449_v33 = vpack.c.bf16 %v79_v29, %v78_v28  ;;  %v80_v34 = vld [vmem:[#allocation6 + $0x60] sm:$0xff]  ;;  %v81_v35 = vld [vmem:[#allocation6 + $0x68] sm:$0xff]  ;;  %v470_v36 = vpack.c.bf16 %v171_v32, %v170_v31  ;;  %v172_v37 = vld [vmem:[#allocation8 + $0x50] sm:$0xff] }
  0x3f   :  { %439 = vmatprep.subr.bf16.mxu0 %v593_v0  ;;  %v173_v38 = vld [vmem:[#allocation8 + $0x58] sm:$0xff]  ;;  %v452_v39 = vpack.c.bf16 %v81_v35, %v80_v34  ;;  %v82_v40 = vld [vmem:[#allocation6 + $0x70] sm:$0xff]  ;;  %v174_v43 = vld [vmem:[#allocation8 + $0x60] sm:$0xff] }
  0x40   :  { %462 = vmatpush3.bf16.msra.mxu1 %v461_v18  ;;  %v83_v41 = vld [vmem:[#allocation6 + $0x78] sm:$0xff]  ;;  %v473_v42 = vpack.c.bf16 %v173_v38, %v172_v37  ;;  %v175_v44 = vld [vmem:[#allocation8 + $0x68] sm:$0xff]  ;;  %v176_v48 = vld [vmem:[#allocation8 + $0x70] sm:$0xff] }
  0x41   :  { %463 = vmatprep.subr.bf16.mxu1 %v593_v0  ;;  %v455_v45 = vpack.c.bf16 %v83_v41, %v82_v40  ;;  %v476_v46 = vpack.c.bf16 %v175_v44, %v174_v43  ;;  %v67_v47 = vld [vmem:[#allocation3] sm:$0xff] }
  0x42   :  { %441 = vmatpush3.bf16.msra.mxu0 %v440_v14  ;;  %v177_v49 = vld [vmem:[#allocation8 + $0x78] sm:$0xff] }
  0x43   :  { %442 = vmatprep.subr.bf16.mxu0 %v593_v0  ;;  %v479_v50 = vpack.c.bf16 %v177_v49, %v176_v48  ;;  %v325_v51 = vld [vmem:[%s721_s2] ss:$0 sm:$0xff] }
  0x44   :  { %465 = vmatpush3.bf16.msra.mxu1 %v464_v24  ;;  %v326_v56 = vld [vmem:[%s723_s4] ss:$0 sm:$0xff]  ;;  %s596_s4 = smov [#allocation9]  }
  0x45   :  { %466 = vmatprep.subr.bf16.mxu1 %v593_v0  ;;  %v327_v60 = vld [vmem:[%s724_s5] ss:$0 sm:$0xff]  ;;  %s315_s20 = sshll.u32 %s596_s4, 4  ;;  %s316_s20 = int_to_ptr.vmem [resolvable:$true] %s315_s20 }
  0x46   :  { %444 = vmatpush3.bf16.msra.mxu0 %v443_v21  ;;  %s560_s5 = scalar_lea.vmem %s316_s20, 16  ;;  %s564_s21 = scalar_lea.vmem %s316_s20, 32 }
  0x47   :  { %445 = vmatprep.subr.bf16.mxu0 %v593_v0  ;;  %p561_p10 = scmp.ne.s32.totalorder %s316_s20, %s560_s5  ;;  %p565_p11 = scmp.lt.s32.totalorder %s316_s20, %s316_s20 }
  0x48   :  { %468 = vmatpush3.bf16.msra.mxu1 %v467_v30  ;;  %p566_p12 = scmp.lt.s32.totalorder %s564_s21, %s560_s5 }
  0x49   :  { %469 = vmatprep.subr.bf16.mxu1 %v593_v0 }
  0x4a   :  { %447 = vmatpush3.bf16.msra.mxu0 %v446_v27  ;;  %p567_p13 = por %p566_p12, %p565_p11 }
  0x4b   :  { %448 = vmatprep.subr.bf16.mxu0 %v593_v0 }
  0x4c   :  { %471 = vmatpush3.bf16.msra.mxu1 %v470_v36  ;;  %p568_p0 = pnand %p567_p13, %p561_p10 }
  0x4d   :  { %472 = vmatprep.subr.bf16.mxu1 %v593_v0 }
  0x4e   :  { %450 = vmatpush3.bf16.msra.mxu0 %v449_v33 }
  0x4f   :  { %451 = vmatprep.subr.bf16.mxu0 %v593_v0 }
  0x50   :  { %474 = vmatpush3.bf16.msra.mxu1 %v473_v42 }
  0x51   :  { %475 = vmatprep.subr.bf16.mxu1 %v593_v0 }
  0x52   :  { %453 = vmatpush3.bf16.msra.mxu0 %v452_v39 }
  0x53   :  { %454 = vmatprep.subr.bf16.mxu0 %v593_v0 }
  0x54   :  { %477 = vmatpush3.bf16.msra.mxu1 %v476_v46 }
  0x55   :  { %478 = vmatprep.subr.bf16.mxu1 %v593_v0  ;;  %v299_v0 = vstv %s725_s6 }
  0x56   :  { %456 = vmatpush3.bf16.msra.mxu0 %v455_v45 }
  0x58   :  { %480 = vmatpush3.bf16.msra.mxu1 %v479_v50 }
  0x59   :  { %396 = vmatmul.mubr.f32.vlgmr.msra.gmra.mrb[0].mxu0 %v67_v47 }
 0x12c   :  { %v157_v52 = vpop.f32.mrb[0].mxu0 }
 0x12d   :  { %v158_v53 = vadd.f32 %v325_v51, %v157_v52  ;;  %v397_v54 = vpop.f32.mrb[1].mxu0 }
 0x12f   :  { %v161_v55 = vmax.f32 %v158_v53, 0.0 }
 0x131   :  { %431 = vmatmul.mubr.f32.vlgmr.msra.gmra.mrb[0].mxu1 %v161_v55 }
 0x204   :  { %v251_v57 = vpop.f32.mrb[0].mxu1 }
 0x205   :  { %v252_v58 = vadd.f32 %v326_v56, %v251_v57  ;;  %v432_v59 = vpop.f32.mrb[1].mxu1 }
 0x207   :  { %v255_v61 = vmax.f32 %v252_v58, 0.0 }
 0x209   :  { %v263_v62 = vmul.f32 %v327_v60, %v255_v61 }
 0x20b   :  { %264 = vadd.xlane.f32.xlu0 %v263_v62 }
 0x298   :  { %v265_v63 = vpop.xlane.xlu0 %264 }
 0x299   :  { %266 = vxpose.xlu0.b32.start.end [1/1] (short) (narrow) %v265_v63, 8 }
 0x319   :  { %v282_v1 = vpop.trf.xlu0 }
 0x31a   :  { %v300_v2 = vadd.f32 %v299_v0, %v282_v1 }
 0x31c   :  { %v328_v3 = vmul.f32 -1.442695, %v300_v2 }
 0x31e   :  { %490 = vpow2.f32 %v328_v3 }
 0x328   :  { %v491_v4 = vpop.eup %490 }
 0x329   :  { %v304_v5 = vadd.f32 1.0, %v491_v4 }
 0x32b   :  { %492 = vrcp.f32 %v304_v5 }
 0x335   :  { %v493_v6 = vpop.eup %492 }
 0x336   :  { %308 = vst.msk [vmem:[#allocation9] sm:$0x1] %vm307_vm1, %v493_v6 }
 0x337   :  { %571 = shalt.err (!%p568_p0)
}
 0x338   :  { %s572_s23 = scalar_lea.hbm %s726_s7, 16 }
 0x339   :  { %p573_p1 = scmp.ne.s32.totalorder %s726_s7, %s572_s23  ;;  %p576_p2 = scmp.lt.u32.totalorder %s572_s23, %s726_s7 }
 0x33b   :  { %p578_p3 = pnand %p576_p2, %p573_p1 }
 0x33d   :  { %581 = shalt.err (!%p578_p3)
}
 0x33e   :  { %318 = dma.vmem_to_hbm [thread:$0]  %s316_s20, 16, %s726_s7, [#allocation5]  }
 0x33f   :  { %586 = dma.done.wait [#allocation5], 16  }
 0x340   :  { %587 = vsyncadd [#allocation5], 4294967280 }
 0x341   :  { %322 = vsyncpa [#allocation4], 1 }
 0x342   :  { %323 = vsyncpa [#allocation7], 1 }
 0x343   :  { %324 = vsyncpa [#allocation5], 1 }

// kernel: tpu_custom_call.1
= control target key start
LH: loop header
LB: loop body
LE: loop exit
PB: predicated region body
PF: predicated region fallthrough
CT: control target
= control target key end

     0   :  { %13 = vsyncpa [#allocation4], 0  ;;  %s719_s0 = inlined_call_operand.hbm [shape: f32[8,128], index: 0, kind: input, shape index: {}]   ;;  %s720_s1 = inlined_call_operand.hbm [shape: f32[128,128], index: 1, kind: input, shape index: {}]   ;;  %s721_s2 = inlined_call_operand.vmem [shape: f32[1,128], index: 2, kind: input, shape index: {}]   ;;  %s722_s3 = inlined_call_operand.hbm [shape: f32[128,128], index: 3, kind: input, shape index: {}]   ;;  %s723_s4 = inlined_call_operand.vmem [shape: f32[1,128], index: 4, kind: input, shape index: {}]   ;;  %s724_s5 = inlined_call_operand.vmem [shape: f32[1,128], index: 5, kind: input, shape index: {}]   ;;  %s725_s6 = inlined_call_operand.<no memory space> [shape: f32[1], index: 6, kind: input, shape index: {}]   ;;  %s726_s7 = inlined_call_operand.hbm [shape: f32[1,8], index: 7, kind: output, shape index: {}]  }
   0x1   :  { %14 = vsyncpa [#allocation7], 0 }
   0x2   :  { %15 = vsyncpa [#allocation5], 0  ;;  %s588_s24 = smov [#allocation6]   ;;  %s494_s28 = scalar_lea.hbm %s720_s1, 2048 }
   0x3   :  { %s31_s25 = sshll.u32 %s588_s24, 4  ;;  %p495_p0 = scmp.ne.s32.totalorder %s720_s1, %s494_s28  ;;  %s32_s25 = int_to_ptr.vmem [resolvable:$true] %s31_s25 }
   0x4   :  { %p498_p1 = scmp.lt.u32.totalorder %s494_s28, %s720_s1 }
   0x6   :  { %p500_p2 = pnand %p498_p1, %p495_p0 }
   0x8   :  { %503 = shalt.err (!%p500_p2)
}
   0x9   :  { %s504_s10 = scalar_lea.vmem %s32_s25, 2048  ;;  %p509_p4 = scmp.lt.s32.totalorder %s32_s25, %s32_s25 }
   0xa   :  { %p505_p3 = scmp.ne.s32.totalorder %s32_s25, %s504_s10  ;;  %p510_p5 = scmp.lt.s32.totalorder %s504_s10, %s504_s10 }
   0xc   :  { %p511_p6 = por %p510_p5, %p509_p4 }
   0xe   :  { %p512_p7 = pnand %p511_p6, %p505_p3 }
  0x10   :  { %515 = shalt.err (!%p512_p7)
}
  0x11   :  { %s589_s11 = smov 128   ;;  %s590_s12 = smov 8  }
  0x12   :  { %37 = dma.hbm_to_vmem [thread:$0]  %s720_s1, 2048, %s32_s25, [#allocation7], %s589_s11, %s589_s11, %s590_s12  }
  0x13   :  { %s591_s15 = smov [#allocation3]   ;;  %s592_s17 = smov [#allocation8]  }
  0x14   :  { %s22_s16 = sshll.u32 %s591_s15, 4  ;;  %s45_s18 = sshll.u32 %s592_s17, 4  ;;  %s23_s16 = int_to_ptr.vmem [resolvable:$true] %s22_s16  ;;  %s46_s18 = int_to_ptr.vmem [resolvable:$true] %s45_s18 }
  0x15   :  { %s516_s21 = scalar_lea.hbm %s719_s0, 128 }
  0x16   :  { %p517_p8 = scmp.ne.s32.totalorder %s719_s0, %s516_s21  ;;  %p520_p9 = scmp.lt.u32.totalorder %s516_s21, %s719_s0 }
  0x18   :  { %p522_p10 = pnand %p520_p9, %p517_p8 }
  0x1a   :  { %525 = shalt.err (!%p522_p10)
}
  0x1b   :  { %s526_s1 = scalar_lea.vmem %s23_s16, 128  ;;  %p531_p12 = scmp.lt.s32.totalorder %s23_s16, %s23_s16 }
  0x1c   :  { %p527_p11 = scmp.ne.s32.totalorder %s23_s16, %s526_s1  ;;  %p532_p13 = scmp.lt.s32.totalorder %s526_s1, %s526_s1 }
  0x1e   :  { %p533_p0 = por %p532_p13, %p531_p12 }
  0x20   :  { %p534_p1 = pnand %p533_p0, %p527_p11 }
  0x22   :  { %537 = shalt.err (!%p534_p1)
}
  0x23   :  { %25 = dma.hbm_to_vmem [thread:$0]  %s719_s0, 128, %s23_s16, [#allocation4]  }
  0x24   :  { %s538_s30 = scalar_lea.hbm %s722_s3, 2048 }
  0x25   :  { %p539_p2 = scmp.ne.s32.totalorder %s722_s3, %s538_s30  ;;  %p542_p3 = scmp.lt.u32.totalorder %s538_s30, %s722_s3 }
  0x27   :  { %p544_p4 = pnand %p542_p3, %p539_p2 }
  0x29   :  { %547 = shalt.err (!%p544_p4)
}
  0x2a   :  { %s548_s14 = scalar_lea.vmem %s46_s18, 2048  ;;  %p553_p6 = scmp.lt.s32.totalorder %s46_s18, %s46_s18 }
  0x2b   :  { %p549_p5 = scmp.ne.s32.totalorder %s46_s18, %s548_s14  ;;  %p554_p7 = scmp.lt.s32.totalorder %s548_s14, %s548_s14 }
  0x2d   :  { %p555_p8 = por %p554_p7, %p553_p6 }
  0x2f   :  { %p556_p9 = pnand %p555_p8, %p549_p5 }
  0x31   :  { %559 = shalt.err (!%p556_p9)
}
  0x32   :  { %51 = dma.hbm_to_vmem [thread:$0]  %s722_s3, 2048, %s46_s18, [#allocation7], %s589_s11, %s589_s11, %s590_s12  }
  0x33   :  { %582 = dma.done.wait [#allocation4], 128  }
  0x34   :  { %583 = vsyncadd [#allocation4], 4294967168 }
  0x35   :  { %584 = dma.done.wait [#allocation7], 4096  }
  0x36   :  { %585 = vsyncadd [#allocation7], 4294963200  ;;  %v593_v0 = vmov 0.0|0.0   ;;  %vm594_vm0 = vmmov 0   ;;  %v595_v1 = vmov 0.0   ;;  %v68_v2 = vld [vmem:[#allocation6] sm:$0xff] }
  0x37   :  { %433 = vmatprep.subr.bf16.mxu0 %v593_v0  ;;  %395 = vmatprep.mubr.msk.f32.mxu0 %vm594_vm0, %v595_v1  ;;  %v69_v3 = vld [vmem:[#allocation6 + $0x8] sm:$0xff]  ;;  %v70_v4 = vld [vmem:[#allocation6 + $0x10] sm:$0xff]  ;;  %v71_v6 = vld [vmem:[#allocation6 + $0x18] sm:$0xff]  ;;  %vm307_vm1 = vcmask 57344  }
  0x38   :  { %457 = vmatprep.subr.bf16.mxu1 %v593_v0  ;;  %430 = vmatprep.mubr.msk.f32.mxu1 %vm594_vm0, %v595_v1  ;;  %v434_v5 = vpack.c.bf16 %v69_v3, %v68_v2  ;;  %v437_v7 = vpack.c.bf16 %v71_v6, %v70_v4  ;;  %v72_v8 = vld [vmem:[#allocation6 + $0x20] sm:$0xff]  ;;  %v73_v9 = vld [vmem:[#allocation6 + $0x28] sm:$0xff]  ;;  %v164_v12 = vld [vmem:[#allocation8 + $0x10] sm:$0xff] }
  0x39   :  { %v162_v10 = vld [vmem:[#allocation8] sm:$0xff]  ;;  %v163_v11 = vld [vmem:[#allocation8 + $0x8] sm:$0xff]  ;;  %v165_v13 = vld [vmem:[#allocation8 + $0x18] sm:$0xff]  ;;  %v440_v14 = vpack.c.bf16 %v73_v9, %v72_v8 }
  0x3a   :  { %435 = vmatpush3.bf16.msra.mxu0 %v434_v5  ;;  %v458_v15 = vpack.c.bf16 %v163_v11, %v162_v10  ;;  %v74_v16 = vld [vmem:[#allocation6 + $0x30] sm:$0xff]  ;;  %v75_v17 = vld [vmem:[#allocation6 + $0x38] sm:$0xff]  ;;  %v461_v18 = vpack.c.bf16 %v165_v13, %v164_v12  ;;  %v166_v19 = vld [vmem:[#allocation8 + $0x20] sm:$0xff] }
  0x3b   :  { %436 = vmatprep.subr.bf16.mxu0 %v593_v0  ;;  %v167_v20 = vld [vmem:[#allocation8 + $0x28] sm:$0xff]  ;;  %v443_v21 = vpack.c.bf16 %v75_v17, %v74_v16  ;;  %v76_v22 = vld [vmem:[#allocation6 + $0x40] sm:$0xff]  ;;  %v168_v25 = vld [vmem:[#allocation8 + $0x30] sm:$0xff] }
  0x3c   :  { %459 = vmatpush3.bf16.msra.mxu1 %v458_v15  ;;  %v77_v23 = vld [vmem:[#allocation6 + $0x48] sm:$0xff]  ;;  %v464_v24 = vpack.c.bf16 %v167_v20, %v166_v19  ;;  %v169_v26 = vld [vmem:[#allocation8 + $0x38] sm:$0xff]  ;;  %v78_v28 = vld [vmem:[#allocation6 + $0x50] sm:$0xff] }
  0x3d   :  { %460 = vmatprep.subr.bf16.mxu1 %v593_v0  ;;  %v446_v27 = vpack.c.bf16 %v77_v23, %v76_v22  ;;  %v79_v29 = vld [vmem:[#allocation6 + $0x58] sm:$0xff]  ;;  %v467_v30 = vpack.c.bf16 %v169_v26, %v168_v25  ;;  %v170_v31 = vld [vmem:[#allocation8 + $0x40] sm:$0xff]  ;;  %v171_v32 = vld [vmem:[#allocation8 + $0x48] sm:$0xff] }
  0x3e   :  { %438 = vmatpush3.bf16.msra.mxu0 %v437_v7  ;;  %v449_v33 = vpack.c.bf16 %v79_v29, %v78_v28  ;;  %v80_v34 = vld [vmem:[#allocation6 + $0x60] sm:$0xff]  ;;  %v81_v35 = vld [vmem:[#allocation6 + $0x68] sm:$0xff]  ;;  %v470_v36 = vpack.c.bf16 %v171_v32, %v170_v31  ;;  %v172_v37 = vld [vmem:[#allocation8 + $0x50] sm:$0xff] }
  0x3f   :  { %439 = vmatprep.subr.bf16.mxu0 %v593_v0  ;;  %v173_v38 = vld [vmem:[#allocation8 + $0x58] sm:$0xff]  ;;  %v452_v39 = vpack.c.bf16 %v81_v35, %v80_v34  ;;  %v82_v40 = vld [vmem:[#allocation6 + $0x70] sm:$0xff]  ;;  %v174_v43 = vld [vmem:[#allocation8 + $0x60] sm:$0xff] }
  0x40   :  { %462 = vmatpush3.bf16.msra.mxu1 %v461_v18  ;;  %v83_v41 = vld [vmem:[#allocation6 + $0x78] sm:$0xff]  ;;  %v473_v42 = vpack.c.bf16 %v173_v38, %v172_v37  ;;  %v175_v44 = vld [vmem:[#allocation8 + $0x68] sm:$0xff]  ;;  %v176_v48 = vld [vmem:[#allocation8 + $0x70] sm:$0xff] }
  0x41   :  { %463 = vmatprep.subr.bf16.mxu1 %v593_v0  ;;  %v455_v45 = vpack.c.bf16 %v83_v41, %v82_v40  ;;  %v476_v46 = vpack.c.bf16 %v175_v44, %v174_v43  ;;  %v67_v47 = vld [vmem:[#allocation3] sm:$0xff] }
  0x42   :  { %441 = vmatpush3.bf16.msra.mxu0 %v440_v14  ;;  %v177_v49 = vld [vmem:[#allocation8 + $0x78] sm:$0xff] }
  0x43   :  { %442 = vmatprep.subr.bf16.mxu0 %v593_v0  ;;  %v479_v50 = vpack.c.bf16 %v177_v49, %v176_v48  ;;  %v325_v51 = vld [vmem:[%s721_s2] ss:$0 sm:$0xff] }
  0x44   :  { %465 = vmatpush3.bf16.msra.mxu1 %v464_v24  ;;  %v326_v56 = vld [vmem:[%s723_s4] ss:$0 sm:$0xff]  ;;  %s596_s4 = smov [#allocation9]  }
  0x45   :  { %466 = vmatprep.subr.bf16.mxu1 %v593_v0  ;;  %v327_v60 = vld [vmem:[%s724_s5] ss:$0 sm:$0xff]  ;;  %s315_s20 = sshll.u32 %s596_s4, 4  ;;  %s316_s20 = int_to_ptr.vmem [resolvable:$true] %s315_s20 }
  0x46   :  { %444 = vmatpush3.bf16.msra.mxu0 %v443_v21  ;;  %s560_s5 = scalar_lea.vmem %s316_s20, 16  ;;  %s564_s21 = scalar_lea.vmem %s316_s20, 32 }
  0x47   :  { %445 = vmatprep.subr.bf16.mxu0 %v593_v0  ;;  %p561_p10 = scmp.ne.s32.totalorder %s316_s20, %s560_s5  ;;  %p565_p11 = scmp.lt.s32.totalorder %s316_s20, %s316_s20 }
  0x48   :  { %468 = vmatpush3.bf16.msra.mxu1 %v467_v30  ;;  %p566_p12 = scmp.lt.s32.totalorder %s564_s21, %s560_s5 }
  0x49   :  { %469 = vmatprep.subr.bf16.mxu1 %v593_v0 }
  0x4a   :  { %447 = vmatpush3.bf16.msra.mxu0 %v446_v27  ;;  %p567_p13 = por %p566_p12, %p565_p11 }
  0x4b   :  { %448 = vmatprep.subr.bf16.mxu0 %v593_v0 }
  0x4c   :  { %471 = vmatpush3.bf16.msra.mxu1 %v470_v36  ;;  %p568_p0 = pnand %p567_p13, %p561_p10 }
  0x4d   :  { %472 = vmatprep.subr.bf16.mxu1 %v593_v0 }
  0x4e   :  { %450 = vmatpush3.bf16.msra.mxu0 %v449_v33 }
  0x4f   :  { %451 = vmatprep.subr.bf16.mxu0 %v593_v0 }
  0x50   :  { %474 = vmatpush3.bf16.msra.mxu1 %v473_v42 }
  0x51   :  { %475 = vmatprep.subr.bf16.mxu1 %v593_v0 }
  0x52   :  { %453 = vmatpush3.bf16.msra.mxu0 %v452_v39 }
  0x53   :  { %454 = vmatprep.subr.bf16.mxu0 %v593_v0 }
  0x54   :  { %477 = vmatpush3.bf16.msra.mxu1 %v476_v46 }
  0x55   :  { %478 = vmatprep.subr.bf16.mxu1 %v593_v0  ;;  %v299_v0 = vstv %s725_s6 }
  0x56   :  { %456 = vmatpush3.bf16.msra.mxu0 %v455_v45 }
  0x58   :  { %480 = vmatpush3.bf16.msra.mxu1 %v479_v50 }
  0x59   :  { %396 = vmatmul.mubr.f32.vlgmr.msra.gmra.mrb[0].mxu0 %v67_v47 }
 0x12c   :  { %v157_v52 = vpop.f32.mrb[0].mxu0 }
 0x12d   :  { %v158_v53 = vadd.f32 %v325_v51, %v157_v52  ;;  %v397_v54 = vpop.f32.mrb[1].mxu0 }
 0x12f   :  { %v161_v55 = vmax.f32 %v158_v53, 0.0 }
 0x131   :  { %431 = vmatmul.mubr.f32.vlgmr.msra.gmra.mrb[0].mxu1 %v161_v55 }
 0x204   :  { %v251_v57 = vpop.f32.mrb[0].mxu1 }
 0x205   :  { %v252_v58 = vadd.f32 %v326_v56, %v251_v57  ;;  %v432_v59 = vpop.f32.mrb[1].mxu1 }
 0x207   :  { %v255_v61 = vmax.f32 %v252_v58, 0.0 }
 0x209   :  { %v263_v62 = vmul.f32 %v327_v60, %v255_v61 }
 0x20b   :  { %264 = vadd.xlane.f32.xlu0 %v263_v62 }
 0x298   :  { %v265_v63 = vpop.xlane.xlu0 %264 }
 0x299   :  { %266 = vxpose.xlu0.b32.start.end [1/1] (short) (narrow) %v265_v63, 8 }
 0x319   :  { %v282_v1 = vpop.trf.xlu0 }
 0x31a   :  { %v300_v2 = vadd.f32 %v299_v0, %v282_v1 }
 0x31c   :  { %v328_v3 = vmul.f32 -1.442695, %v300_v2 }
 0x31e   :  { %490 = vpow2.f32 %v328_v3 }
 0x328   :  { %v491_v4 = vpop.eup %490 }
 0x329   :  { %v304_v5 = vadd.f32 1.0, %v491_v4 }
 0x32b   :  { %492 = vrcp.f32 %v304_v5 }
 0x335   :  { %v493_v6 = vpop.eup %492 }
 0x336   :  { %308 = vst.msk [vmem:[#allocation9] sm:$0x1] %vm307_vm1, %v493_v6 }
 0x337   :  { %571 = shalt.err (!%p568_p0)
}
 0x338   :  { %s572_s23 = scalar_lea.hbm %s726_s7, 16 }
 0x339   :  { %p573_p1 = scmp.ne.s32.totalorder %s726_s7, %s572_s23  ;;  %p576_p2 = scmp.lt.u32.totalorder %s572_s23, %s726_s7 }
 0x33b   :  { %p578_p3 = pnand %p576_p2, %p573_p1 }
 0x33d   :  { %581 = shalt.err (!%p578_p3)
}
 0x33e   :  { %318 = dma.vmem_to_hbm [thread:$0]  %s316_s20, 16, %s726_s7, [#allocation5]  }
 0x33f   :  { %586 = dma.done.wait [#allocation5], 16  }
 0x340   :  { %587 = vsyncadd [#allocation5], 4294967280 }
 0x341   :  { %322 = vsyncpa [#allocation4], 1 }
 0x342   :  { %323 = vsyncpa [#allocation7], 1 }
 0x343   :  { %324 = vsyncpa [#allocation5], 1 }

</bundles_post_ra>
